<compile_context>
chip_gen: v7x
topology: tpu7x:2x2x1
jax: 0.10.0
libtpu: 0.0.40
codegen_flags: <defaults>
</compile_context>

<pallas_src>
import functools

import jax
import jax.numpy as jnp
from jax import lax
from jax.experimental import pallas as pl
from jax.experimental.pallas import tpu as pltpu

_NUM_CORES = 2  # leading "parallel" axis: shards across v7x's 2 TCs, runs
                # serially (at most one cheap masked extra step) on v5e/v6e.


def _loss_kernel(logits_ref, targets_ref, recon_ref, orig_ref, *rest,
                 batch, rows_total, tile_rows, tile_cols,
                 blocks_per_core, acc_rows, need_mask, use_kl):
    """Grid = (core, block).  Streams (tile_rows, tile_cols) image tiles."""
    if use_kl:
        mu_ref, logvar_ref, out_ref, acc_ref = rest
    else:
        out_ref, acc_ref = rest

    i = pl.program_id(1)

    @pl.when(i == 0)
    def _():
        acc_ref[...] = jnp.zeros_like(acc_ref)

    # ---- squared error for this tile (cast to f32 in-kernel, VPU) ----
    diff = recon_ref[...].astype(jnp.float32) - orig_ref[...].astype(jnp.float32)
    sq = diff * diff

    if need_mask:
        # Mask rows past the real data: covers the ragged last block and the
        # duplicated (index-clamped) block on the second core when the block
        # count is odd.
        logical_block = pl.program_id(0) * blocks_per_core + i
        row = lax.broadcasted_iota(jnp.int32, (tile_rows, 1), 0)
        sq = jnp.where(logical_block * tile_rows + row < rows_total, sq, 0.0)

    # ---- vreg-wide accumulation: fold 8-row slabs with VPU adds only ----
    if acc_rows == 8:
        part = sq[0:8, :]
        for r0 in range(8, tile_rows, 8):
            part = part + sq[r0:r0 + 8, :]
        acc_ref[...] += part
    else:  # tiny single-block case (rows not a multiple of 8)
        acc_ref[...] += jnp.sum(sq, axis=0, keepdims=True)

    # ---- finalize (once per core): cross-lane reduce + tiny BCE / KL terms ----
    @pl.when(i == pl.num_programs(1) - 1)
    def _():
        sse = jnp.sum(acc_ref[...])

        # BCEWithLogits on a lane-dense (1, Bpad) block; mask padded lanes.
        x = logits_ref[...].astype(jnp.float32)
        y = targets_ref[...].astype(jnp.float32)
        col = lax.broadcasted_iota(jnp.int32, x.shape, 1)
        bce = jnp.maximum(x, 0.0) - x * y + jnp.log1p(jnp.exp(-jnp.abs(x)))
        cls_loss = jnp.sum(jnp.where(col < batch, bce, 0.0)) * (1.0 / batch)

        if use_kl:
            mu = mu_ref[...].astype(jnp.float32)
            lv = logvar_ref[...].astype(jnp.float32)
            kl_loss = -0.5 * jnp.sum(1.0 + lv - mu * mu - jnp.exp(lv)) * (1.0 / batch)
        else:
            kl_loss = jnp.float32(0.0)

        # Pack [cls, sse, kl] into lanes 0..2 of this core's (1, 8, 128) block.
        lane = lax.broadcasted_iota(jnp.int32, out_ref.shape, 2)
        out_ref[...] = (jnp.where(lane == 0, cls_loss, 0.0)
                        + jnp.where(lane == 1, sse, 0.0)
                        + jnp.where(lane == 2, kl_loss, 0.0))


def _pad_last(v, target):
    n = v.shape[-1]
    if n < target:
        v = jnp.pad(v, [(0, 0)] * (v.ndim - 1) + [(0, target - n)])
    return v


def genconvit_loss(classification, targets, reconstruction, original_images,
                   mu=None, logvar=None, *,
                   classification_weight=0.9,
                   reconstruction_weight=0.1,
                   kl_weight=0.01,
                   variant="ED",
                   target_block_bytes=4 * 1024 * 1024,
                   vmem_limit_bytes=40 * 1024 * 1024):
    """Mirrors GenConViTLoss.forward.

    classification: [B, 1] logits
    targets:        [B] float labels in {0, 1}
    reconstruction / original_images: [B, C, H, W] (any float dtype; cast in-kernel)
    mu / logvar:    [B, latent_dim] (VAE variant only)
    Returns a dict of scalar loss components.
    """
    B = targets.shape[0]

    # ---- lane-dense classification block: (1, Bpad), Bpad multiple of 128 ----
    b_pad = pl.cdiv(B, 128) * 128
    logits2d = _pad_last(classification.reshape(1, B), b_pad)
    targets2d = _pad_last(targets.reshape(1, B), b_pad)

    n_elem = int(reconstruction.size)
    itemsize = jnp.dtype(reconstruction.dtype).itemsize

    # Lane width: largest value dividing n_elem so the (rows, cols) reshape is
    # a free view (no wrapper-side pad/copy of the big image tensors).
    tile_cols = None
    for cand in (2048, 1024, 512, 256, 128):
        if n_elem % cand == 0:
            tile_cols = cand
            break
    n_padded = n_elem
    if tile_cols is None:
        # TODO(synk): rare ragged fallback (n_elem not a multiple of 128) still
        # pays one pad copy; real image tensors essentially never hit this.
        tile_cols = 128
        n_padded = pl.cdiv(n_elem, 128) * 128
    rows_total = n_padded // tile_cols

    # Block rows: multiple of 32 (bf16/int8 sublane packing), sized so each
    # input block is ~target_block_bytes (multi-MiB => ~85-90% of HBM roofline;
    # 2 inputs x 2 buffers x 4 MiB = 16 MiB in flight fits every generation).
    target_rows = max(32, (target_block_bytes // (itemsize * tile_cols)) // 32 * 32)
    tile_rows = rows_total if target_rows >= rows_total else target_rows

    n_blocks = pl.cdiv(rows_total, tile_rows)
    blocks_per_core = pl.cdiv(n_blocks, _NUM_CORES)

    if n_padded > n_elem:
        pad = n_padded - n_elem
        recon2d = jnp.pad(reconstruction.reshape(-1), (0, pad)).reshape(rows_total, tile_cols)
        orig2d = jnp.pad(original_images.reshape(-1), (0, pad)).reshape(rows_total, tile_cols)
    else:
        recon2d = reconstruction.reshape(rows_total, tile_cols)
        orig2d = original_images.reshape(rows_total, tile_cols)

    need_mask = (n_blocks * tile_rows != rows_total) or \
                (_NUM_CORES * blocks_per_core != n_blocks)
    acc_rows = 8 if tile_rows % 8 == 0 else 1
    use_kl = (variant == "VAE") and (mu is not None) and (logvar is not None)

    kernel = functools.partial(
        _loss_kernel, batch=B, rows_total=rows_total, tile_rows=tile_rows,
        tile_cols=tile_cols, blocks_per_core=blocks_per_core,
        acc_rows=acc_rows, need_mask=need_mask, use_kl=use_kl)

    def _resident(shape):
        return pl.BlockSpec(shape, lambda c, i: (0,) * len(shape))

    if _NUM_CORES * blocks_per_core == n_blocks:
        img_map = lambda c, i: (c * blocks_per_core + i, 0)
    else:
        # Clamp so the duplicated (masked-off) block never DMAs out of bounds.
        img_map = lambda c, i: (jnp.minimum(c * blocks_per_core + i, n_blocks - 1), 0)

    in_specs = [
        _resident((1, b_pad)),                               # logits   (resident)
        _resident((1, b_pad)),                               # targets  (resident)
        pl.BlockSpec((tile_rows, tile_cols), img_map),       # recon tiles
        pl.BlockSpec((tile_rows, tile_cols), img_map),       # orig tiles
    ]
    args = [logits2d, targets2d, recon2d, orig2d]
    if use_kl:
        in_specs += [_resident(mu.shape), _resident(logvar.shape)]
        args += [mu, logvar]

    kl_elems = mu.size if use_kl else 0
    cost = pl.CostEstimate(
        flops=3 * n_elem + 10 * b_pad + 6 * kl_elems,
        transcendentals=b_pad + kl_elems,
        bytes_accessed=2 * n_elem * itemsize + 2 * b_pad * 4 + 2 * kl_elems * 4,
    )

    out = pl.pallas_call(
        kernel,
        out_shape=jax.ShapeDtypeStruct((_NUM_CORES, 8, 128), jnp.float32),
        grid=(_NUM_CORES, blocks_per_core),
        in_specs=in_specs,
        out_specs=pl.BlockSpec((1, 8, 128), lambda c, i: (c, 0, 0)),
        scratch_shapes=[pltpu.VMEM((acc_rows, tile_cols), jnp.float32)],
        compiler_params=pltpu.CompilerParams(
            dimension_semantics=("parallel", "arbitrary"),
            vmem_limit_bytes=vmem_limit_bytes),
        cost_estimate=cost,
    )(*args)

    # Combine per-core partials + final scalar weighting (trivial scalar ops).
    cls_loss = out[0, 0, 0]
    sse = jnp.sum(out[:, 0, 1])
    rec_loss = sse * (1.0 / n_elem)
    total = classification_weight * cls_loss + reconstruction_weight * rec_loss
    losses = {"classification": cls_loss, "reconstruction": rec_loss}
    if use_kl:
        kl_loss = out[0, 0, 2]
        losses["kl_divergence"] = kl_loss
        total = total + kl_weight * kl_loss
    losses["total"] = total
    return losses


def _reference_loss(classification, targets, reconstruction, original_images,
                    mu=None, logvar=None, cw=0.9, rw=0.1, kw=0.01, use_kl=True):
    x = classification.reshape(-1).astype(jnp.float32)
    y = targets.astype(jnp.float32)
    bce = jnp.mean(jnp.maximum(x, 0.0) - x * y + jnp.log1p(jnp.exp(-jnp.abs(x))))
    r = reconstruction.astype(jnp.float32)
    o = original_images.astype(jnp.float32)
    mse = jnp.mean((r - o) ** 2)
    total = cw * bce + rw * mse
    out = {"classification": bce, "reconstruction": mse}
    if use_kl:
        mu32 = mu.astype(jnp.float32)
        lv32 = logvar.astype(jnp.float32)
        kl = jnp.mean(-0.5 * jnp.sum(1.0 + lv32 - mu32 ** 2 - jnp.exp(lv32), axis=1))
        out["kl_divergence"] = kl
        total = total + kw * kl
    out["total"] = total
    return out


if __name__ == "__main__":
    key = jax.random.PRNGKey(0)
    kc, kt, kr, ko, km, kv = jax.random.split(key, 6)

    # --- test 1: VAE variant, tiny single-block case (odd block count ->
    #             clamped + masked duplicate step on the second core lane) ---
    B, C, H, W, LATENT = 2, 4, 16, 16, 32
    classification = jax.random.normal(kc, (B, 1), jnp.float32)
    targets = jax.random.bernoulli(kt, 0.5, (B,)).astype(jnp.float32)
    reconstruction = jax.random.normal(kr, (B, C, H, W), jnp.float32)
    original_images = jax.random.normal(ko, (B, C, H, W), jnp.float32)
    mu = jax.random.normal(km, (B, LATENT), jnp.float32)
    logvar = 0.1 * jax.random.normal(kv, (B, LATENT), jnp.float32)

    losses = genconvit_loss(classification, targets, reconstruction,
                            original_images, mu, logvar, variant="VAE")
    jax.block_until_ready(losses["total"])
    ref = _reference_loss(classification, targets, reconstruction,
                          original_images, mu, logvar, use_kl=True)
    for k in ("classification", "reconstruction", "kl_divergence", "total"):
        assert jnp.allclose(losses[k], ref[k], rtol=1e-5, atol=1e-5), (
            f"VAE mismatch in {k}: {losses[k]} vs {ref[k]}")

    # --- test 2: VAE variant, multi-block streaming grid + ragged last block ---
    B2, C2, H2, W2 = 5, 3, 128, 128
    kc2, kt2, kr2, ko2, km2, kv2 = jax.random.split(jax.random.PRNGKey(1), 6)
    cls2 = jax.random.normal(kc2, (B2, 1), jnp.float32)
    tgt2 = jax.random.bernoulli(kt2, 0.5, (B2,)).astype(jnp.float32)
    rec2 = jax.random.normal(kr2, (B2, C2, H2, W2), jnp.float32)
    org2 = jax.random.normal(ko2, (B2, C2, H2, W2), jnp.float32)
    mu2 = jax.random.normal(km2, (B2, LATENT), jnp.float32)
    lv2 = 0.1 * jax.random.normal(kv2, (B2, LATENT), jnp.float32)

    # small target_block_bytes to force several blocks per core at test sizes
    losses2 = genconvit_loss(cls2, tgt2, rec2, org2, mu2, lv2, variant="VAE",
                             target_block_bytes=256 * 1024)
    jax.block_until_ready(losses2["total"])
    ref2 = _reference_loss(cls2, tgt2, rec2, org2, mu2, lv2, use_kl=True)
    for k in ("classification", "reconstruction", "kl_divergence", "total"):
        assert jnp.allclose(losses2[k], ref2[k], rtol=1e-5, atol=1e-5), (
            f"VAE multi-block mismatch in {k}: {losses2[k]} vs {ref2[k]}")

    # --- test 3: ED variant, bf16 images (in-kernel cast path, no KL inputs) ---
    rec_bf16 = reconstruction.astype(jnp.bfloat16)
    org_bf16 = original_images.astype(jnp.bfloat16)
    losses_ed = genconvit_loss(classification, targets, rec_bf16, org_bf16,
                               variant="ED")
    jax.block_until_ready(losses_ed["total"])
    ref_ed = _reference_loss(classification, targets, rec_bf16, org_bf16,
                             use_kl=False)
    for k in ("classification", "reconstruction", "total"):
        assert jnp.allclose(losses_ed[k], ref_ed[k], rtol=1e-5, atol=1e-5), (
            f"ED mismatch in {k}: {losses_ed[k]} vs {ref_ed[k]}")
    assert "kl_divergence" not in losses_ed

    print("KERNEL_OK")
</pallas_src>

<mosaic_0001>
module attributes {stable_mosaic.version = 11 : i64} {
  func.func @_loss_kernel(%arg0: i32, %arg1: i32, %arg2: memref<1x128xf32, #tpu.memory_space<vmem>>, %arg3: memref<1x128xf32, #tpu.memory_space<vmem>>, %arg4: memref<1x2048xf32, #tpu.memory_space<vmem>>, %arg5: memref<1x2048xf32, #tpu.memory_space<vmem>>, %arg6: memref<2x32xf32, #tpu.memory_space<vmem>>, %arg7: memref<2x32xf32, #tpu.memory_space<vmem>>, %arg8: memref<1x8x128xf32, #tpu.memory_space<vmem>>, %arg9: memref<1x2048xf32, #tpu.memory_space<vmem>>) attributes {dimension_semantics = [#tpu.dimension_semantics<parallel>, #tpu.dimension_semantics<arbitrary>], iteration_bounds = array<i64: 2, 1>, scalar_prefetch = 0 : i64, scratch_operands = 1 : i64, tpu.core_type = #tpu.core_type<tc>, window_params = [{pipeline_mode = #tpu.pipeline_mode<synchronous>, transform_indices = @transform_0, window_bounds = array<i64: 1, 128>}, {pipeline_mode = #tpu.pipeline_mode<synchronous>, transform_indices = @transform_1, window_bounds = array<i64: 1, 128>}, {transform_indices = @transform_2, window_bounds = array<i64: 1, 2048>}, {transform_indices = @transform_3, window_bounds = array<i64: 1, 2048>}, {pipeline_mode = #tpu.pipeline_mode<synchronous>, transform_indices = @transform_4, window_bounds = array<i64: 2, 32>}, {pipeline_mode = #tpu.pipeline_mode<synchronous>, transform_indices = @transform_5, window_bounds = array<i64: 2, 32>}, {transform_indices = @transform_6, window_bounds = array<i64: 1, 8, 128>}]} {
    %c0_i32 = arith.constant 0 : i32
    %0 = arith.cmpi eq, %arg1, %c0_i32 : i32
    %1 = arith.extui %0 : i1 to i32
    %c0_i32_0 = arith.constant 0 : i32
    %2 = arith.cmpi ne, %1, %c0_i32_0 : i32
    scf.if %2 {
      %cst_13 = arith.constant 0.000000e+00 : f32
      %27 = vector.broadcast %cst_13 : f32 to vector<1x2048xf32>
      %c0_14 = arith.constant 0 : index
      %c0_15 = arith.constant 0 : index
      %28 = vector.load %arg9[%c0_14, %c0_15] : memref<1x2048xf32, #tpu.memory_space<vmem>>, vector<1x2048xf32>
      tpu.vector_store %arg9[%c0_14, %c0_15], %27 {strides = array<i32>} : memref<1x2048xf32, #tpu.memory_space<vmem>>, vector<1x2048xf32>,
    } else {
    }
    %c0 = arith.constant 0 : index
    %c0_1 = arith.constant 0 : index
    %3 = vector.load %arg4[%c0, %c0_1] : memref<1x2048xf32, #tpu.memory_space<vmem>>, vector<1x2048xf32>
    %c0_2 = arith.constant 0 : index
    %c0_3 = arith.constant 0 : index
    %4 = vector.load %arg5[%c0_2, %c0_3] : memref<1x2048xf32, #tpu.memory_space<vmem>>, vector<1x2048xf32>
    %5 = arith.subf %3, %4 : vector<1x2048xf32>
    %6 = arith.mulf %5, %5 : vector<1x2048xf32>
    %c1_i32 = arith.constant 1 : i32
    %7 = arith.muli %arg0, %c1_i32 : i32
    %8 = arith.addi %7, %arg1 : i32
    %9 = tpu.iota {dimensions = array<i32: 0>} : vector<1x1xi32>
    %c1_i32_4 = arith.constant 1 : i32
    %10 = arith.muli %8, %c1_i32_4 : i32
    %11 = vector.broadcast %10 : i32 to vector<1x1xi32>
    %12 = arith.addi %11, %9 : vector<1x1xi32>
    %c1_i32_5 = arith.constant 1 : i32
    %13 = vector.broadcast %c1_i32_5 : i32 to vector<1x1xi32>
    %14 = arith.cmpi slt, %12, %13 : vector<1x1xi32>
    %cst = arith.constant 0.000000e+00 : f32
    %15 = vector.shape_cast %14 : vector<1x1xi1> to vector<1x1xi1>
    %16 = vector.broadcast %15 : vector<1x1xi1> to vector<1x2048xi1>
    %17 = vector.broadcast %cst : f32 to vector<1x2048xf32>
    %18 = arith.select %16, %6, %17 : vector<1x2048xi1>, vector<1x2048xf32>
    %c0_6 = arith.constant 0 : index
    %c0_7 = arith.constant 0 : index
    %19 = vector.load %arg9[%c0_6, %c0_7] : memref<1x2048xf32, #tpu.memory_space<vmem>>, vector<1x2048xf32>
    %cst_8 = arith.constant dense<0.000000e+00> : vector<2048xf32>
    %20 = vector.multi_reduction <add>, %18, %cst_8 [0] : vector<1x2048xf32> to vector<2048xf32>
    %21 = vector.shape_cast %20 : vector<2048xf32> to vector<1x2048xf32>
    %22 = arith.addf %19, %21 : vector<1x2048xf32>
    %c0_9 = arith.constant 0 : index
    %c0_10 = arith.constant 0 : index
    %23 = vector.load %arg9[%c0_9, %c0_10] : memref<1x2048xf32, #tpu.memory_space<vmem>>, vector<1x2048xf32>
    tpu.vector_store %arg9[%c0_9, %c0_10], %22 {strides = array<i32>} : memref<1x2048xf32, #tpu.memory_space<vmem>>, vector<1x2048xf32>,
    %c0_i32_11 = arith.constant 0 : i32
    %24 = arith.cmpi eq, %arg1, %c0_i32_11 : i32
    %25 = arith.extui %24 : i1 to i32
    %c0_i32_12 = arith.constant 0 : i32
    %26 = arith.cmpi ne, %25, %c0_i32_12 : i32
    scf.if %26 {
      %c0_13 = arith.constant 0 : index
      %c0_14 = arith.constant 0 : index
      %27 = vector.load %arg9[%c0_13, %c0_14] : memref<1x2048xf32, #tpu.memory_space<vmem>>, vector<1x2048xf32>
      %28 = vector.shape_cast %27 : vector<1x2048xf32> to vector<1x1x2048xf32>
      %cst_15 = arith.constant dense<0.000000e+00> : vector<1xf32>
      %29 = vector.multi_reduction <add>, %28, %cst_15 [1, 2] : vector<1x1x2048xf32> to vector<1xf32>
      %30 = vector.shape_cast %29 : vector<1xf32> to vector<1x1x1xf32>
      %31 = vector.extract %30[0, 0, 0] : f32 from vector<1x1x1xf32>
      %c0_16 = arith.constant 0 : index
      %c0_17 = arith.constant 0 : index
      %32 = vector.load %arg2[%c0_16, %c0_17] : memref<1x128xf32, #tpu.memory_space<vmem>>, vector<1x128xf32>
      %c0_18 = arith.constant 0 : index
      %c0_19 = arith.constant 0 : index
      %33 = vector.load %arg3[%c0_18, %c0_19] : memref<1x128xf32, #tpu.memory_space<vmem>>, vector<1x128xf32>
      %34 = tpu.iota {dimensions = array<i32: 1>} : vector<1x128xi32>
      %cst_20 = arith.constant 0.000000e+00 : f32
      %35 = vector.broadcast %cst_20 : f32 to vector<1x128xf32>
      %36 = arith.maximumf %32, %35 : vector<1x128xf32>
      %37 = arith.mulf %32, %33 : vector<1x128xf32>
      %38 = arith.subf %36, %37 : vector<1x128xf32>
      %39 = math.absf %32 : vector<1x128xf32>
      %cst_21 = arith.constant 0.000000e+00 : f32
      %40 = vector.broadcast %cst_21 : f32 to vector<1x128xf32>
      %41 = arith.subf %40, %39 : vector<1x128xf32>
      %42 = math.exp %41 : vector<1x128xf32>
      %43 = math.log1p %42 : vector<1x128xf32>
      %44 = arith.addf %38, %43 : vector<1x128xf32>
      %c2_i32 = arith.constant 2 : i32
      %45 = vector.broadcast %c2_i32 : i32 to vector<1x128xi32>
      %46 = arith.cmpi slt, %34, %45 : vector<1x128xi32>
      %cst_22 = arith.constant 0.000000e+00 : f32
      %47 = vector.broadcast %cst_22 : f32 to vector<1x128xf32>
      %48 = arith.select %46, %44, %47 : vector<1x128xi1>, vector<1x128xf32>
      %49 = vector.shape_cast %48 : vector<1x128xf32> to vector<1x1x128xf32>
      %cst_23 = arith.constant dense<0.000000e+00> : vector<1xf32>
      %50 = vector.multi_reduction <add>, %49, %cst_23 [1, 2] : vector<1x1x128xf32> to vector<1xf32>
      %51 = vector.shape_cast %50 : vector<1xf32> to vector<1x1x1xf32>
      %52 = vector.extract %51[0, 0, 0] : f32 from vector<1x1x1xf32>
      %cst_24 = arith.constant 5.000000e-01 : f32
      %53 = arith.mulf %52, %cst_24 : f32
      %c0_25 = arith.constant 0 : index
      %c0_26 = arith.constant 0 : index
      %54 = vector.load %arg6[%c0_25, %c0_26] : memref<2x32xf32, #tpu.memory_space<vmem>>, vector<2x32xf32>
      %c0_27 = arith.constant 0 : index
      %c0_28 = arith.constant 0 : index
      %55 = vector.load %arg7[%c0_27, %c0_28] : memref<2x32xf32, #tpu.memory_space<vmem>>, vector<2x32xf32>
      %cst_29 = arith.constant 1.000000e+00 : f32
      %56 = vector.broadcast %cst_29 : f32 to vector<2x32xf32>
      %57 = arith.addf %56, %55 : vector<2x32xf32>
      %58 = arith.mulf %54, %54 : vector<2x32xf32>
      %59 = arith.subf %57, %58 : vector<2x32xf32>
      %60 = math.exp %55 : vector<2x32xf32>
      %61 = arith.subf %59, %60 : vector<2x32xf32>
      %62 = vector.shape_cast %61 : vector<2x32xf32> to vector<1x2x32xf32>
      %cst_30 = arith.constant dense<0.000000e+00> : vector<1xf32>
      %63 = vector.multi_reduction <add>, %62, %cst_30 [1, 2] : vector<1x2x32xf32> to vector<1xf32>
      %64 = vector.shape_cast %63 : vector<1xf32> to vector<1x1x1xf32>
      %65 = vector.extract %64[0, 0, 0] : f32 from vector<1x1x1xf32>
      %cst_31 = arith.constant -5.000000e-01 : f32
      %66 = arith.mulf %cst_31, %65 : f32
      %cst_32 = arith.constant 5.000000e-01 : f32
      %67 = arith.mulf %66, %cst_32 : f32
      %68 = tpu.iota {dimensions = array<i32: 2>} : vector<1x8x128xi32>
      %c0_i32_33 = arith.constant 0 : i32
      %69 = vector.broadcast %c0_i32_33 : i32 to vector<1x8x128xi32>
      %70 = arith.cmpi eq, %68, %69 : vector<1x8x128xi32>
      %cst_34 = arith.constant 0.000000e+00 : f32
      %71 = vector.broadcast %53 : f32 to vector<1x8x128xf32>
      %72 = vector.broadcast %cst_34 : f32 to vector<1x8x128xf32>
      %73 = arith.select %70, %71, %72 : vector<1x8x128xi1>, vector<1x8x128xf32>
      %c1_i32_35 = arith.constant 1 : i32
      %74 = vector.broadcast %c1_i32_35 : i32 to vector<1x8x128xi32>
      %75 = arith.cmpi eq, %68, %74 : vector<1x8x128xi32>
      %cst_36 = arith.constant 0.000000e+00 : f32
      %76 = vector.broadcast %31 : f32 to vector<1x8x128xf32>
      %77 = vector.broadcast %cst_36 : f32 to vector<1x8x128xf32>
      %78 = arith.select %75, %76, %77 : vector<1x8x128xi1>, vector<1x8x128xf32>
      %79 = arith.addf %73, %78 : vector<1x8x128xf32>
      %c2_i32_37 = arith.constant 2 : i32
      %80 = vector.broadcast %c2_i32_37 : i32 to vector<1x8x128xi32>
      %81 = arith.cmpi eq, %68, %80 : vector<1x8x128xi32>
      %cst_38 = arith.constant 0.000000e+00 : f32
      %82 = vector.broadcast %67 : f32 to vector<1x8x128xf32>
      %83 = vector.broadcast %cst_38 : f32 to vector<1x8x128xf32>
      %84 = arith.select %81, %82, %83 : vector<1x8x128xi1>, vector<1x8x128xf32>
      %85 = arith.addf %79, %84 : vector<1x8x128xf32>
      %c0_39 = arith.constant 0 : index
      %c0_40 = arith.constant 0 : index
      %c0_41 = arith.constant 0 : index
      %86 = vector.load %arg8[%c0_39, %c0_40, %c0_41] : memref<1x8x128xf32, #tpu.memory_space<vmem>>, vector<1x8x128xf32>
      tpu.vector_store %arg8[%c0_39, %c0_40, %c0_41], %85 {strides = array<i32>} : memref<1x8x128xf32, #tpu.memory_space<vmem>>, vector<1x8x128xf32>,
    } else {
    }
    return
  }
  func.func @transform_0(%arg0: i32, %arg1: i32) -> (i32, i32) {
    %c0_i32 = arith.constant 0 : i32
    %c0_i32_0 = arith.constant 0 : i32
    %c0_i32_1 = arith.constant 0 : i32
    return %c0_i32, %c0_i32_0 : i32, i32
  }
  func.func @transform_1(%arg0: i32, %arg1: i32) -> (i32, i32) {
    %c0_i32 = arith.constant 0 : i32
    %c0_i32_0 = arith.constant 0 : i32
    %c0_i32_1 = arith.constant 0 : i32
    return %c0_i32, %c0_i32_0 : i32, i32
  }
  func.func @transform_2(%arg0: i32, %arg1: i32) -> (i32, i32) {
    %c1_i32 = arith.constant 1 : i32
    %0 = arith.muli %arg0, %c1_i32 : i32
    %1 = arith.addi %0, %arg1 : i32
    %c0_i32 = arith.constant 0 : i32
    %2 = arith.minsi %1, %c0_i32 : i32
    %c0_i32_0 = arith.constant 0 : i32
    %c0_i32_1 = arith.constant 0 : i32
    return %2, %c0_i32_0 : i32, i32
  }
  func.func @transform_3(%arg0: i32, %arg1: i32) -> (i32, i32) {
    %c1_i32 = arith.constant 1 : i32
    %0 = arith.muli %arg0, %c1_i32 : i32
    %1 = arith.addi %0, %arg1 : i32
    %c0_i32 = arith.constant 0 : i32
    %2 = arith.minsi %1, %c0_i32 : i32
    %c0_i32_0 = arith.constant 0 : i32
    %c0_i32_1 = arith.constant 0 : i32
    return %2, %c0_i32_0 : i32, i32
  }
  func.func @transform_4(%arg0: i32, %arg1: i32) -> (i32, i32) {
    %c0_i32 = arith.constant 0 : i32
    %c0_i32_0 = arith.constant 0 : i32
    %c0_i32_1 = arith.constant 0 : i32
    return %c0_i32, %c0_i32_0 : i32, i32
  }
  func.func @transform_5(%arg0: i32, %arg1: i32) -> (i32, i32) {
    %c0_i32 = arith.constant 0 : i32
    %c0_i32_0 = arith.constant 0 : i32
    %c0_i32_1 = arith.constant 0 : i32
    return %c0_i32, %c0_i32_0 : i32, i32
  }
  func.func @transform_6(%arg0: i32, %arg1: i32) -> (i32, i32, i32) {
    %c0_i32 = arith.constant 0 : i32
    %c0_i32_0 = arith.constant 0 : i32
    %c0_i32_1 = arith.constant 0 : i32
    return %arg0, %c0_i32, %c0_i32_0 : i32, i32, i32
  }
}

</mosaic_0001>

<bundles_post_ra>
// kernel: tpu_custom_call.1
= control target key start
LH: loop header
LB: loop body
LE: loop exit
PB: predicated region body
PF: predicated region fallthrough
CT: control target
= control target key end

     0   :  { %s1660_s0 = inlined_call_operand.hbm [shape: f32[1,128], index: 0, kind: input, shape index: {}]   ;;  %s1661_s1 = inlined_call_operand.vmem [shape: f32[1,128], index: 1, kind: input, shape index: {}]   ;;  %s1662_s2 = inlined_call_operand.hbm [shape: f32[1,2048], index: 2, kind: input, shape index: {}]   ;;  %s1663_s3 = inlined_call_operand.hbm [shape: f32[1,2048], index: 3, kind: input, shape index: {}]   ;;  %s1664_s4 = inlined_call_operand.vmem [shape: f32[2,32], index: 4, kind: input, shape index: {}]   ;;  %s1665_s5 = inlined_call_operand.vmem [shape: f32[2,32], index: 5, kind: input, shape index: {}]   ;;  %s1666_s6 = inlined_call_operand.hbm [shape: f32[2,8,128], index: 6, kind: output, shape index: {}]  }
   0x1   :  { %1674 = sst [smem:[#allocation16_spill]] %s1662_s2 }
   0x2   :  { %11 = vsyncpa [#allocation4], 0 }
   0x3   :  { %12 = vsyncpa [#allocation7], 0 }
   0x4   :  { %14 = vsyncpa [#allocation7 + $0x1], 0 }
   0x5   :  { %15 = vsyncpa [#allocation5], 0 }
   0x6   :  { %17 = vsyncpa [#allocation5 + $0x1], 0  ;;  %s1303_s21 = smov 0   ;;  %s1305_s22 = smov 0  }
   0x7   :  { %s1307_s23 = smov 0   ;;  %s1309_s24 = smov 0  }
   0x8   :  { %s1311_s25 = smov 0   ;;  %s1313_s26 = smov 0  }
   0x9   :  { %s1315_s27 = smov 0   ;;  %s1317_s28 = smov 0  }
   0xa LB: > { %1675 = sst [smem:[#allocation13_spill]] %s1257_s27  ;;  %s35_s29 = sadd.s32 1, %s1257_s27  ;;  %s1261_s28 = sphi %s1317_s28, %s23_s28   ;;  %s1257_s27 = sphi %s1315_s27, %s1697_s27   ;;  %s1253_s26 = sphi %s1313_s26, %s1696_s26   ;;  %s1249_s25 = sphi %s1311_s25, %s1650_s25   ;;  %s1245_s24 = sphi %s1309_s24, %s1701_s24   ;;  %s1241_s23 = sphi %s1307_s23, %s1700_s23   ;;  %s1237_s22 = sphi %s1305_s22, %s1699_s22   ;;  %s1233_s21 = sphi %s1303_s21, %s1698_s21  }
   0xb   : > { %p37_p0 = scmp.ge.s32.totalorder %s35_s29, 2  ;;  %p1230_p1 = scmp.ne.s32.totalorder %s1249_s25, 0 }
   0xc   : > { %p98_p2 = scmp.eq.s32.totalorder %s1261_s28, 0  ;;  %p983_p5 = scmp.lt.s32.totalorder %s1261_s28, 2 }
   0xd   : > { %s1703_s29 = smov (%p37_p0, %s35_s29), 0  ;;  %s247_s7 = sand.u32 1, %s1261_s28  }
   0xe   : > { %1676 = sst [smem:[#allocation14_spill]] %s1703_s29  ;;  %p99_p3 = por %p1230_p1, %p98_p2 }
   0xf   : > { %s187_s30 = ssub.s32 %s1257_s27, %s1703_s29  ;;  %s1263_s10 = smov [#allocation6]  }
  0x10   : > { %p1353_p6 = pnand %p983_p5, %p99_p3  ;;  %p1357_p7 = scmp.eq.s32.totalorder %s187_s30, 0 }
  0x11   : > { %s262_s11 = sshll.u32 %s1263_s10, 4  ;;  %s1361_s12 = scalar_lea.sflag [#allocation7], %s247_s7  ;;  %s263_s11 = int_to_ptr.vmem [resolvable:$true] %s262_s11 }
  0x12   : > { %s1678_s9 = scalar_select %p1357_p7, 1, 0 }
  0x13   : > { %s1679_s2 = sld [smem:[#allocation16_spill]]  ;;  %p1068_p9 = pneg %p1353_p6 }
  0x19   : > { %s1066_s15 = scalar_lea.hbm %s1679_s2, 256 }
  0x1a   : > { %p1067_p8 = scmp.ne.s32.totalorder %s1679_s2, %s1066_s15  ;;  %p1073_p12 = scmp.lt.u32.totalorder %s1066_s15, %s1066_s15 }
  0x1b   : > { %p1075_p13 = scmp.lt.u32.totalorder %s1066_s15, %s1679_s2 }
  0x1c   : > { %p1069_p10 = pnand %p1068_p9, %p1067_p8 }
  0x1d   : > { %p1076_p0 = por %p1075_p13, %p1073_p12 }
  0x1e   : > { %p1070_p11 = pneg %p1069_p10 }
  0x20   : > { %p1077_p1 = pnand %p1076_p0, %p1070_p11 }
  0x22   : > { %1080 = shalt.err (!%p1077_p1)
}
  0x23   : > { %s1081_s20 = scalar_lea.vmem %s263_s11, 256  ;;  %s1088_s30 = scalar_lea.vmem %s263_s11, 512 }
  0x24   : > { %p1082_p2 = scmp.ne.s32.totalorder %s263_s11, %s1081_s20  ;;  %p1089_p4 = scmp.lt.s32.totalorder %s263_s11, %s263_s11 }
  0x25   : > { %p1090_p7 = scmp.lt.s32.totalorder %s1088_s30, %s1081_s20 }
  0x26   : > { %p1084_p3 = pnand %p1082_p2, %p1068_p9 }
  0x27   : > { %p1091_p8 = por %p1090_p7, %p1089_p4 }
  0x28   : > { %p1085_p5 = pneg %p1084_p3 }
  0x2a   : > { %p1092_p10 = pnand %p1091_p8, %p1085_p5 }
  0x2c   : > { %1095 = shalt.err (!%p1092_p10)
}
  0x2d   : > { %974 = dma.hbm_to_vmem [thread:$0]  (!%p1353_p6), %s1679_s2, 256, %s263_s11, %s1361_s12  }
  0x2e   : > { %s1387_s13 = sadd.s32 4294967295, %s1261_s28   ;;  %s930_s14 = sadd.s32 4294967294, %s1261_s28  }
  0x2f   : > { %p103_p4 = scmp.ne.s32.totalorder %s1249_s25, %s1245_s24  ;;  %p1668_p7 = scmp.eq.s32.totalorder %s1387_s13, 0 }
  0x30   : > { %s190_s15 = sadd.s32 1, %s1241_s23  ;;  %p1680_p11 = scmp.ne.s32.totalorder %s1678_s9, 0 }
  0x31   : > { %p1401_p12 = por %p1668_p7, %p103_p4  ;;  %p200_p13 = scmp.ne.s32.totalorder %s1241_s23, %s1237_s22 }
  0x32   : > { %s1397_s16 = scalar_select %p1680_p11, %s1241_s23, %s190_s15  }
  0x33   : > { %s1682_s17 = scalar_select %p1401_p12, 1, 0 }
  0x34   : > { %1681 = sst [smem:[#allocation15_spill]] %s1397_s16  ;;  %p201_p0 = scmp.eq.s32.totalorder %s1387_s13, 1 }
  0x35   : > { %p206_p1 = scmp.ne.s32.totalorder %s1237_s22, %s1233_s21  ;;  %p207_p2 = scmp.eq.s32.totalorder %s930_s14, 1 }
  0x36   : > { %p931_p3 = scmp.ge.s32.totalorder %s1261_s28, 1  ;;  %p1411_p5 = por %p201_p0, %p200_p13 }
  0x37   : > { %p214_p8 = scmp.lt.s32.totalorder %s1261_s28, 3  ;;  %p1416_p10 = por %p207_p2, %p206_p1 }
  0x38   : > { %s1683_s11 = scalar_select %p1411_p5, 1, 0 }
  0x39   : > { %s1684_s24 = scalar_select %p1416_p10, 1, 0 }
  0x3a   : > { %p1420_p4 = pnand %p931_p3, %p214_p8  ;;  %s1264_s18 = smov [#allocation3]  }
  0x3b   : > { %s227_s19 = sshll.u32 %s1264_s18, 4  ;;  %s1265_s20 = smov [#allocation8]   ;;  %s1426_s19 = int_to_ptr.vmem [resolvable:$true] %s227_s19 }
  0x3c   : > { %s1685_s9 = scalar_select %p1420_p4, 1, 0 }
  0x3d   : > { %s284_s30 = sshll.u32 %s1265_s20, 4  ;;  %p967_p11 = pneg %p1420_p4  ;;  %s285_s30 = int_to_ptr.vmem [resolvable:$true] %s284_s30 }
  0x3e   : > { %s1096_s15 = scalar_lea.hbm %s1663_s3, 256 }
  0x3f   : > { %p1430_p13 = pnand %p967_p11, %p1668_p7  ;;  %p1097_p0 = scmp.ne.s32.totalorder %s1663_s3, %s1096_s15 }
  0x40   : > { %p1103_p3 = scmp.lt.u32.totalorder %s1096_s15, %s1096_s15  ;;  %p1105_p8 = scmp.lt.u32.totalorder %s1096_s15, %s1663_s3 }
  0x41   : > { %s1686_s7 = scalar_select %p1430_p13, 1, 0 }
  0x42   : > { %p1099_p1 = pnand %p1097_p0, %p1068_p9  ;;  %p1106_p11 = por %p1105_p8, %p1103_p3 }
  0x44   : > { %p1100_p2 = pneg %p1099_p1 }
  0x46   : > { %p1107_p7 = pnand %p1106_p11, %p1100_p2 }
  0x48   : > { %1110 = shalt.err (!%p1107_p7)
}
  0x49   : > { %s1111_s27 = scalar_lea.vmem %s285_s30, 256  ;;  %s1118_s2 = scalar_lea.vmem %s285_s30, 512 }
  0x4a   : > { %p1112_p10 = scmp.ne.s32.totalorder %s285_s30, %s1111_s27  ;;  %p1119_p4 = scmp.lt.s32.totalorder %s285_s30, %s285_s30 }
  0x4b   : > { %p1120_p13 = scmp.lt.s32.totalorder %s1118_s2, %s1111_s27 }
  0x4c   : > { %p1114_p5 = pnand %p1112_p10, %p1068_p9 }
  0x4d   : > { %p1121_p0 = por %p1120_p13, %p1119_p4 }
  0x4e   : > { %p1115_p12 = pneg %p1114_p5 }
  0x50   : > { %p1122_p1 = pnand %p1121_p0, %p1115_p12 }
  0x52   : > { %1125 = shalt.err (!%p1122_p1)
}
  0x53   : > { %977 = dma.hbm_to_vmem [thread:$0]  (!%p1353_p6), %s1663_s3, 256, %s285_s30, %s1361_s12  }
  0x54   : > { %s1126_s18 = scalar_lea.hbm %s1660_s0, 16  ;;  %p1687_p7 = scmp.ne.s32.totalorder %s1686_s7, 0 }
  0x55   : > { %p1127_p9 = scmp.ne.s32.totalorder %s1660_s0, %s1126_s18  ;;  %p1133_p4 = scmp.lt.u32.totalorder %s1126_s18, %s1660_s0 }
  0x56   : > { %p1128_p5 = pneg %p1687_p7 }
  0x58   : > { %p1129_p12 = pnand %p1128_p5, %p1127_p9 }
  0x5a   : > { %p1130_p10 = pneg %p1129_p12 }
  0x5c   : > { %p1135_p13 = pnand %p1133_p4, %p1130_p10 }
  0x5e   : > { %1138 = shalt.err (!%p1135_p13)
}
  0x5f   : > { %s1139_s12 = scalar_lea.vmem %s1426_s19, 16  ;;  %s1146_s16 = scalar_lea.vmem %s1426_s19, 32 }
  0x60   : > { %p1140_p6 = scmp.ne.s32.totalorder %s1426_s19, %s1139_s12  ;;  %p1147_p8 = scmp.lt.s32.totalorder %s1426_s19, %s1426_s19 }
  0x61   : > { %p1148_p11 = scmp.lt.s32.totalorder %s1146_s16, %s1139_s12 }
  0x62   : > { %p1142_p2 = pnand %p1140_p6, %p1128_p5 }
  0x63   : > { %p1149_p0 = por %p1148_p11, %p1147_p8 }
  0x64   : > { %p1143_p3 = pneg %p1142_p2 }
  0x66   : > { %p1150_p1 = pnand %p1149_p0, %p1143_p3 }
  0x68   : > { %1153 = shalt.err (!%p1150_p1)
}
  0x69   : > { %970 = dma.hbm_to_vmem [thread:$0]  (!%p1687_p7), %s1660_s0, 16, %s1426_s19, [#allocation4]  }
  0x6a   : > { %p1688_p9 = scmp.ne.s32.totalorder %s1685_s9, 0 }
  0x6b   : > { %p1689_p5 = scmp.eq.s32.totalorder (!%p1688_p9), %s1387_s13, 0 }
  0x6c   : > { %293 = sbr.rel (%p1688_p9) target bundleno = 412 (0x19c), region = 44 }
  0x73   : > { %1219 = dma.done.wait (%p1689_p5), [#allocation4], 16   ;;  %p1690_p12 = pmov %p1689_p5 }
  0x74   : > { %s299_s29 = sand.u32 1, %s1387_s13   ;;  %s301_s10 = sand.u32 1, %s1249_s25  }
  0x75   : > { %1221 = vsyncadd (%p1690_p12), [#allocation4], 4294967280  ;;  %s942_s7 = sshll.u32 %s301_s10, 4  ;;  %s300_s14 = scalar_lea.sflag [#allocation7], %s299_s29 }
  0x76   : > { %s303_s15 = scalar_lea.vmem [#allocation6], %s942_s7  ;;  %p1691_p10 = scmp.ne.s32.totalorder %s1682_s17, 0 }
  0x78   : > { %1223 = dma.done.wait (%p1691_p10), %s300_s14, 512  }
  0x79   : > { %1225 = vsyncadd (%p1691_p10), %s300_s14, 4294966784  ;;  %v367_v0 = vlaneseq  ;;  %v1266_v2 = vmov 1966171168   ;;  %v369_v4 = vstv %s1253_s26  ;;  %v772_v7 = vld [vmem:[%s1664_s4] sm:$0x3]  ;;  %v358_v9 = vld [vmem:[%s303_s15] sm:$0xff] }
  0x7a   : > { %v511_v3 = vunpack.c.l.s4 %v1266_v2  ;;  %v773_v8 = vld [vmem:[%s1665_s5] sm:$0x3]  ;;  %v775_v13 = vmul.f32 %v772_v7, %v772_v7  ;;  %s312_s17 = scalar_lea.vmem [#allocation8], %s942_s7  ;;  %v1507_v23 = vld [vmem:[#allocation3] sm:$0x1]  ;;  %vm780_vm0 = vcmask 254976  }
  0x7b   : > { %v368_v1 = vshrl.u32 %v367_v0, 7  ;;  %v774_v12 = vadd.f32 1.0, %v773_v8  ;;  %v777_v14 = vmul.f32 1.442695, %v773_v8  ;;  %v359_v15 = vld [vmem:[%s303_s15 + $0x8] sm:$0xff]  ;;  %v360_v16 = vld [vmem:[%s312_s17] sm:$0xff] }
  0x7c   : > { %v512_v11 = vunpack.c.0.s8 %v511_v3  ;;  %v361_v17 = vld [vmem:[%s312_s17 + $0x8] sm:$0xff]  ;;  %v362_v19 = vsub.f32 %v358_v9, %v360_v16  ;;  %v745_v31 = vand.u32 2147483647, %v1507_v23  ;;  %vm697_vm2 = vcmask 1040384   ;;  %s343_s8 = sand.u32 1, %s1237_s22   ;;  %s946_s14 = sshll.u32 %s1253_s26, 7 }
  0x7d   : > { %v1491_v5 = vsub.s32 0, %v368_v1  ;;  %v1493_v6 = vsub.s32 1, %v368_v1  ;;  %v1501_v10 = vsub.s32 2, %v368_v1  ;;  %v370_v18 = vadd.s32 %v369_v4, %v368_v1  ;;  %s944_s16 = sshll.u32 %s343_s8, 3  ;;  %s1607_s18 = scalar_lea.hbm %s1666_s6, %s946_s14 }
  0x7e   : > { %v363_v20 = vsub.f32 %v359_v15, %v361_v17  ;;  %v1503_v21 = vsub.s32 3, %v368_v1  ;;  %v1505_v22 = vsub.s32 4, %v368_v1  ;;  %1060 = vpow2.f32 %v777_v14  ;;  %s345_s15 = scalar_lea.vmem [#allocation9], %s944_s16  ;;  %s806_s17 = scalar_lea.sflag [#allocation5], %s343_s8 }
  0x7f   : > { %v1509_v24 = vsub.s32 5, %v368_v1  ;;  %v1511_v25 = vsub.s32 6, %v368_v1  ;;  %v1513_v26 = vsub.s32 7, %v368_v1  ;;  %v364_v27 = vmul.f32 %v362_v19, %v362_v19  ;;  %s819_s13 = sshll.u32 %s345_s15, 4  ;;  %p1692_p4 = scmp.ne.s32.totalorder %s1683_s11, 0  ;;  %s1609_s13 = int_to_ptr.vmem [resolvable:$true] %s819_s13 }
  0x80   : > { %v365_v28 = vmul.f32 %v363_v20, %v363_v20  ;;  %v776_v29 = vsub.f32 %v774_v12, %v775_v13  ;;  %vm371_vm1 = vcmp.lt.s32.totalorder %v370_v18, 1  ;;  %v1515_v30 = vsub.s32 %v512_v11, %v368_v1  ;;  %s1154_s20 = scalar_lea.vmem %s1609_s13, 128  ;;  %s1267_s26 = smov [#allocation9]  }
  0x81   : > { %v379_v32 = vrot.slane %v364_v27, %v1491_v5  ;;  %v383_v33 = vrot.slane %v364_v27, %v1493_v6  ;;  %v387_v34 = vrot.slane %v364_v27, %v1501_v10  ;;  %v391_v35 = vrot.slane %v364_v27, %v1503_v21  ;;  %p1155_p7 = scmp.ne.s32.totalorder %s1609_s13, %s1154_s20  ;;  %s1158_s27 = sshll.u32 %s1267_s26, 4  ;;  %s1159_s27 = int_to_ptr.vmem [resolvable:$false] %s1158_s27 }
  0x82   : > { %v395_v36 = vrot.slane %v364_v27, %v1505_v22  ;;  %v399_v37 = vrot.slane %v364_v27, %v1509_v24  ;;  %v403_v38 = vrot.slane %v364_v27, %v1511_v25  ;;  %v407_v39 = vrot.slane %v364_v27, %v1513_v26  ;;  %p1161_p2 = scmp.lt.s32.totalorder %s1609_s13, %s1159_s27 }
  0x83   : > { %v411_v40 = vrot.slane %v365_v28, %v1491_v5  ;;  %v415_v41 = vrot.slane %v365_v28, %v1493_v6  ;;  %v419_v42 = vrot.slane %v365_v28, %v1501_v10  ;;  %v423_v43 = vrot.slane %v365_v28, %v1503_v21  ;;  %p1156_p13 = pnand %p1155_p7, %p1692_p4 }
  0x84   : > { %v427_v44 = vrot.slane %v365_v28, %v1505_v22  ;;  %v431_v45 = vrot.slane %v365_v28, %v1509_v24  ;;  %v435_v46 = vrot.slane %v365_v28, %v1511_v25  ;;  %v439_v47 = vrot.slane %v365_v28, %v1513_v26 }
  0x85   : > { %v456_v48 = vsel %vm371_vm1, %v379_v32, 0.0  ;;  %v457_v49 = vsel %vm371_vm1, %v383_v33, 0.0  ;;  %v458_v50 = vsel %vm371_vm1, %v387_v34, 0.0  ;;  %v459_v51 = vsel %vm371_vm1, %v391_v35, 0.0  ;;  %p1157_p6 = pneg %p1156_p13 }
  0x86   : > { %v460_v52 = vsel %vm371_vm1, %v395_v36, 0.0  ;;  %v461_v53 = vsel %vm371_vm1, %v399_v37, 0.0  ;;  %v462_v54 = vsel %vm371_vm1, %v403_v38, 0.0  ;;  %v463_v55 = vsel %vm371_vm1, %v407_v39, 0.0 }
  0x87   : > { %v464_v56 = vsel %vm371_vm1, %v411_v40, 0.0  ;;  %v465_v57 = vsel %vm371_vm1, %v415_v41, 0.0  ;;  %v466_v58 = vsel %vm371_vm1, %v419_v42, 0.0  ;;  %v467_v59 = vsel %vm371_vm1, %v423_v43, 0.0 }
  0x88   : > { %v1061_v60 = vpop.eup %1060  ;;  %v468_v61 = vsel %vm371_vm1, %v427_v44, 0.0  ;;  %v469_v62 = vsel %vm371_vm1, %v431_v45, 0.0  ;;  %v470_v63 = vsel %vm371_vm1, %v435_v46, 0.0  ;;  %v471_v1 = vsel %vm371_vm1, %v439_v47, 0.0 }
  0x89   : > { %v779_v2 = vsub.f32 %v776_v29, %v1061_v60  ;;  %v506_v3 = vcombine.low %v456_v48, %v457_v49  ;;  %v507_v4 = vcombine.low %v458_v50, %v459_v51  ;;  %v508_v7 = vcombine.low %v460_v52, %v461_v53 }
  0x8a   : > { %v509_v8 = vcombine.low %v462_v54, %v463_v55  ;;  %v555_v9 = vcombine.low %v464_v56, %v465_v57  ;;  %v556_v11 = vcombine.low %v466_v58, %v467_v59  ;;  %v557_v12 = vcombine.low %v468_v61, %v469_v62 }
  0x8b   : > { %v781_v13 = vsel %vm780_vm0, %v779_v2, 0.0  ;;  %v516_v14 = vrot.slane %v506_v3, %v1515_v30  ;;  %v523_v15 = vrot.slane %v507_v4, %v1515_v30  ;;  %v530_v16 = vrot.slane %v508_v7, %v1515_v30 }
  0x8c   : > { %782 = vadd.xlane.f32.xlu1 %v781_v13  ;;  %v537_v17 = vrot.slane %v509_v8, %v1515_v30  ;;  %v558_v18 = vcombine.low %v470_v63, %v471_v1  ;;  %v746_v20 = vsub.f32 0.0, %v745_v31  ;;  %v565_v28 = vrot.slane %v555_v9, %v1515_v30 }
  0x8d   : > { %v538_v19 = vcombine.low %v516_v14, %v523_v15  ;;  %v572_v29 = vrot.slane %v556_v11, %v1515_v30  ;;  %v579_v33 = vrot.slane %v557_v12, %v1515_v30 }
  0x8e   : > { %v539_v27 = vcombine.low %v530_v16, %v537_v17  ;;  %v586_v34 = vrot.slane %v558_v18, %v1515_v30  ;;  %v747_v35 = vmul.f32 1.442695, %v746_v20  ;;  %v742_v18 = vmax.f32 %v1507_v23, 0.0 }
  0x8f   : > { %v546_v32 = vrot.slane %v538_v19, %v1515_v30  ;;  %v587_v38 = vcombine.low %v565_v28, %v572_v29 }
  0x90   : > { %v553_v36 = vrot.slane %v539_v27, %v1515_v30  ;;  %1062 = vpow2.f32 %v747_v35  ;;  %v588_v39 = vcombine.low %v579_v33, %v586_v34 }
  0x91   : > { %v595_v43 = vrot.slane %v587_v38, %v1515_v30 }
  0x92   : > { %v554_v37 = vcombine.low %v546_v32, %v553_v36  ;;  %v602_v44 = vrot.slane %v588_v39, %v1515_v30 }
  0x94   : > { %v620_v31 = vrot.slane %v554_v37, %v1491_v5  ;;  %v624_v40 = vrot.slane %v554_v37, %v1493_v6  ;;  %v628_v41 = vrot.slane %v554_v37, %v1501_v10  ;;  %v632_v42 = vrot.slane %v554_v37, %v1503_v21 }
  0x95   : > { %v636_v45 = vrot.slane %v554_v37, %v1505_v22  ;;  %v640_v50 = vrot.slane %v554_v37, %v1509_v24  ;;  %v603_v54 = vcombine.low %v595_v43, %v602_v44  ;;  %v644_v55 = vrot.slane %v554_v37, %v1511_v25 }
  0x96   : > { %v698_v46 = vsel %vm697_vm2, %v620_v31, 0.0  ;;  %v699_v47 = vsel %vm697_vm2, %v624_v40, 0.0  ;;  %v701_v48 = vsel %vm697_vm2, %v628_v41, 0.0  ;;  %v703_v51 = vsel %vm697_vm2, %v632_v42, 0.0 }
  0x97   : > { %v700_v49 = vadd.f32 %v699_v47, %v698_v46  ;;  %v705_v30 = vsel %vm697_vm2, %v636_v45, 0.0  ;;  %v648_v58 = vrot.slane %v554_v37, %v1513_v26  ;;  %v707_v59 = vsel %vm697_vm2, %v640_v50, 0.0 }
  0x98   : > { %v652_v61 = vrot.slane %v603_v54, %v1491_v5  ;;  %v709_v62 = vsel %vm697_vm2, %v644_v55, 0.0  ;;  %v656_v1 = vrot.slane %v603_v54, %v1493_v6  ;;  %v660_v7 = vrot.slane %v603_v54, %v1501_v10  ;;  %v739_v5 = vld [vmem:[%s1661_s1] sm:$0x1] }
  0x99   : > { %v702_v53 = vadd.f32 %v701_v48, %v700_v49  ;;  %v711_v2 = vsel %vm697_vm2, %v648_v58, 0.0  ;;  %v664_v11 = vrot.slane %v603_v54, %v1503_v21  ;;  %v668_v16 = vrot.slane %v603_v54, %v1505_v22 }
  0x9a   : > { %v1063_v52 = vpop.eup %1062  ;;  %v713_v8 = vsel %vm697_vm2, %v652_v61, 0.0  ;;  %v715_v12 = vsel %vm697_vm2, %v656_v1, 0.0  ;;  %v717_v17 = vsel %vm697_vm2, %v660_v7, 0.0  ;;  %v743_v19 = vmul.f32 %v739_v5, %v1507_v23 }
  0x9b   : > { %v749_v56 = vadd.f32 1.0, %v1063_v52  ;;  %v704_v57 = vadd.f32 %v703_v51, %v702_v53  ;;  %v752_v3 = vmul.f32 -0.5, %v1063_v52  ;;  %v755_v6 = vand.u32 2147483647, %v1063_v52 }
  0x9c   : > { %v672_v21 = vrot.slane %v603_v54, %v1509_v24  ;;  %v719_v20 = vsel %vm697_vm2, %v664_v11, 0.0  ;;  %v676_v32 = vrot.slane %v603_v54, %v1511_v25  ;;  %v721_v33 = vsel %vm697_vm2, %v668_v16, 0.0 }
  0x9d   : > { %1064 = vlog2.f32 %v749_v56  ;;  %v706_v60 = vadd.f32 %v705_v30, %v704_v57  ;;  %v753_v13 = vadd.f32 1.0, %v752_v3  ;;  %vm756_vm3 = vcmp.lt.f32.partialorder %v755_v6, 0.0004427343 }
  0x9e   : > { %v744_v34 = vsub.f32 %v742_v18, %v743_v19  ;;  %v680_v35 = vrot.slane %v603_v54, %v1513_v26  ;;  %v723_v36 = vsel %vm697_vm2, %v672_v21, 0.0  ;;  %v741_v23 = vand.u32 127, %v367_v0 }
  0x9f   : > { %v708_v63 = vadd.f32 %v707_v59, %v706_v60  ;;  %v754_v28 = vmul.f32 %v1063_v52, %v753_v13  ;;  %v725_v38 = vsel %vm697_vm2, %v676_v32, 0.0 }
  0xa0   : > { %v727_v40 = vsel %vm697_vm2, %v680_v35, 0.0  ;;  %vm759_vm4 = vcmp.lt.s32.totalorder %v741_v23, 2  ;;  %vm796_vm5 = vcmp.eq.s32.totalorder %v741_v23, 1  ;;  %vm793_vm6 = vcmp.eq.s32.totalorder %v741_v23, 0 }
  0xa1   : > { %v710_v4 = vadd.f32 %v709_v62, %v708_v63  ;;  %vm800_vm7 = vcmp.eq.s32.totalorder %v741_v23, 2 }
  0xa3   : > { %v712_v9 = vadd.f32 %v711_v2, %v710_v4 }
  0xa5   : > { %v714_v14 = vadd.f32 %v713_v8, %v712_v9 }
  0xa7   : > { %v1065_v15 = vpop.eup %1064  ;;  %v716_v10 = vadd.f32 %v715_v12, %v714_v14 }
  0xa8   : > { %v751_v27 = vmul.f32 0.6931472, %v1065_v15 }
  0xa9   : > { %v718_v29 = vadd.f32 %v717_v17, %v716_v10 }
  0xaa   : > { %v757_v37 = vsel %vm756_vm3, %v754_v28, %v751_v27 }
  0xab   : > { %v720_v22 = vadd.f32 %v719_v20, %v718_v29  ;;  %v758_v31 = vadd.f32 %v757_v37, %v744_v34 }
  0xad   : > { %v722_v24 = vadd.f32 %v721_v33, %v720_v22  ;;  %v760_v42 = vsel %vm759_vm4, %v758_v31, 0.0 }
  0xae   : > { %v761_v43 = vsel %vm697_vm2, %v760_v42, 0.0 }
  0xaf   : > { %v724_v39 = vadd.f32 %v723_v36, %v722_v24 }
  0xb1   : > { %v726_v25 = vadd.f32 %v725_v38, %v724_v39 }
  0xb3   : > { %v728_v41 = vadd.f32 %v727_v40, %v726_v25 }
  0xb5   : > { %729 = vadd.xlane.f32.xlu0 %v728_v41 }
  0xb9   : > { %762 = vadd.xlane.f32.xlu0 %v761_v43 }
 0x119   : > { %v783_v26 = vpop.xlane.xlu1 %782 }
 0x11a   : > { %v784_v44 = vrot.slane %v783_v26, 4 }
 0x11c   : > { %v785_v45 = vadd.f32 %v784_v44, %v783_v26 }
 0x11e   : > { %v786_v48 = vrot.slane %v785_v45, 2 }
 0x120   : > { %v787_v54 = vadd.f32 %v786_v48, %v785_v45 }
 0x122   : > { %v788_v58 = vrot.slane %v787_v54, 1 }
 0x124   : > { %v789_v61 = vadd.f32 %v788_v58, %v787_v54 }
 0x142   : > { %v730_v0 = vpop.xlane.xlu0 %729 }
 0x143   : > { %v731_v46 = vrot.slane %v730_v0, 4 }
 0x145   : > { %v732_v47 = vadd.f32 %v731_v46, %v730_v0 }
 0x146   : > { %v763_v49 = vpop.xlane.xlu0 %762 }
 0x147   : > { %v733_v50 = vrot.slane %v732_v47, 2  ;;  %v764_v51 = vrot.slane %v763_v49, 4 }
 0x149   : > { %v765_v52 = vadd.f32 %v764_v51, %v763_v49  ;;  %v734_v53 = vadd.f32 %v733_v50, %v732_v47 }
 0x14b   : > { %v766_v55 = vrot.slane %v765_v52, 2  ;;  %v735_v30 = vrot.slane %v734_v53, 1 }
 0x14d   : > { %v767_v56 = vadd.f32 %v766_v55, %v765_v52  ;;  %v736_v57 = vadd.f32 %v735_v30, %v734_v53 }
 0x14f   : > { %951 = vpush %v736_v57  ;;  %v768_v59 = vrot.slane %v767_v56, 1 }
 0x151   : > { %v769_v60 = vadd.f32 %v768_v59, %v767_v56 }
 0x153   : > { %953 = vpush %v769_v60 }
 0x154   : > { %955 = vpush %v789_v61 }
 0x180   : > { %s952_s12 = spop %951 }
 0x181   : > { %v797_v62 = vstv %s952_s12  ;;  %s1160_s12 = scalar_lea.vmem %s1159_s27, 256 }
 0x182   : > { %v798_v1 = vsel %vm796_vm5, %v797_v62, 0.0  ;;  %p1162_p3 = scmp.lt.s32.totalorder %s1160_s12, %s1154_s20 }
 0x184   : > { %s954_s30 = spop %953  ;;  %p1163_p8 = por %p1162_p3, %p1161_p2 }
 0x185   : > { %s771_s2 = smul.f32 0.5, %s954_s30  ;;  %s956_s29 = spop %955 }
 0x186   : > { %s791_s10 = smul.f32 -0.5, %s956_s29  ;;  %p1164_p11 = pnand %p1163_p8, %p1157_p6 }
 0x187   : > { %v794_v63 = vstv %s771_s2 }
 0x188   : > { %v795_v2 = vsel %vm793_vm6, %v794_v63, 0.0  ;;  %s792_s7 = smul.f32 0.5, %s791_s10 }
 0x189   : > { %v799_v3 = vadd.f32 %v798_v1, %v795_v2 }
 0x18a   : > { %v801_v4 = vstv %s792_s7 }
 0x18b   : > { %v802_v7 = vsel %vm800_vm7, %v801_v4, 0.0 }
 0x18c   : > { %v803_v8 = vadd.f32 %v802_v7, %v799_v3 }
 0x18e   : > { %804 = vst [vmem:[%s345_s15] sm:$0xff] %v803_v8 }
 0x18f   : > { %1167 = shalt.err (!%p1164_p11)
}
 0x190   : > { %s1168_s8 = scalar_lea.hbm %s1607_s18, 128  ;;  %s1172_s2 = scalar_lea.hbm %s1666_s6, 256 }
 0x191   : > { %p1169_p0 = scmp.ne.s32.totalorder %s1607_s18, %s1168_s8  ;;  %p1173_p5 = scmp.lt.u32.totalorder %s1607_s18, %s1666_s6 }
 0x192   : > { %p1174_p12 = scmp.lt.u32.totalorder %s1172_s2, %s1168_s8  ;;  %p1176_p7 = scmp.lt.u32.totalorder %s1168_s8, %s1607_s18 }
 0x193   : > { %p1170_p1 = pnand %p1169_p0, %p1692_p4 }
 0x194   : > { %p1175_p10 = por %p1174_p12, %p1173_p5 }
 0x195   : > { %p1171_p9 = pneg %p1170_p1 }
 0x196   : > { %p1177_p13 = por %p1176_p7, %p1175_p10 }
 0x198   : > { %p1178_p6 = pnand %p1177_p13, %p1171_p9 }
 0x19a   : > { %1181 = shalt.err (!%p1178_p6)
}
 0x19b   : > { %965 = dma.vmem_to_hbm [thread:$0]  (%p1692_p4), %s1609_s13, 128, %s1607_s18, %s806_s17  }
 0x19c PF: > { %s831_s7 = sand.u32 1, %s1233_s21   ;;  %p1693_p2 = scmp.ne.s32.totalorder %s1684_s24, 0 }
 0x19d   : > { %p1694_p3 = scmp.ge.s32.totalorder %s1261_s28, 2  ;;  %s832_s14 = scalar_lea.sflag [#allocation5], %s831_s7 }
 0x19f   : > { %p979_p8 = pnand %p1694_p3, %p1693_p2 }
 0x1a1   : > { %1227 = dma.done.wait (!%p979_p8), %s832_s14, 128  }
 0x1a2   : > { %1229 = vsyncadd (!%p979_p8), %s832_s14, 4294967168  ;;  %s23_s28 = sadd.s32 1, %s1261_s28   ;;  %s1695_s11 = sld [smem:[#allocation15_spill]] }
 0x1a3   : > { %p20_p11 = scmp.ge.s32.totalorder %s23_s28, 4   ;;  %s1696_s26 = sld [smem:[#allocation13_spill]] }
 0x1a4   : > { %s1697_s27 = sld [smem:[#allocation14_spill]]  ;;  %s1698_s21 = smov %s1237_s22 }
 0x1a5   : > { %s1699_s22 = smov %s1241_s23  ;;  %s1701_s24 = smov %s1249_s25 }
 0x1a6   : > { %s1650_s25 = smov 0   ;;  %22 = sbr.rel (!%p20_p11) target bundleno = 10 (0xa), region = 113 }
 0x1a8   : > { %s1700_s23 = smov %s1695_s11 }
 0x1ad   :  { %837 = vsyncpa [#allocation4], 1 }
 0x1ae   :  { %839 = vsyncpa [#allocation4 + $0x1], 1 }
 0x1af   :  { %840 = vsyncpa [#allocation7], 1 }
 0x1b0   :  { %842 = vsyncpa [#allocation7 + $0x1], 1 }
 0x1b1   :  { %843 = vsyncpa [#allocation5], 1 }
 0x1b2   :  { %845 = vsyncpa [#allocation5 + $0x1], 1 }

</bundles_post_ra>
